<compile_context>
chip_gen: v7x
topology: tpu7x:2x2x1
jax: 0.10.0
libtpu: 0.0.40
codegen_flags: <defaults>
</compile_context>

<pallas_src>
import functools

import numpy as np
import jax
import jax.numpy as jnp
from jax.experimental import pallas as pl
from jax.experimental.pallas import tpu as pltpu

JITTER = 1e-5
_BILINEAR_MAX_OUT_DIM = 12  # above this, bilinear constants (~out_dim^5) get too big


# --------------------------------------------------------------------------- #
# Kernels
# --------------------------------------------------------------------------- #
def psd_kernel_bilinear(x_ref, w1t_ref, b1_ref, w2t_ref, b2_ref, ab_ref, o_ref,
                        *, out_dim, jitter):
    """Small out_dim path: fused bilinear scatter + VPU k-reduction."""
    o = out_dim
    oo = o * o
    w = o * oo
    # MLP: v = tanh(x @ W1^T + b1) @ W2^T + b2   (f32 accumulation on MXU)
    h = jnp.dot(x_ref[...], w1t_ref[...], preferred_element_type=jnp.float32)
    h = jnp.tanh(h + b1_ref[...])
    v = jnp.dot(h, w2t_ref[...], preferred_element_type=jnp.float32) + b2_ref[...]
    # One fused matmul against AB = [A | B]:
    #   pa[b, k*oo + i*o + j] = L[b, i, k]
    #   pb[b, k*oo + i*o + j] = L[b, j, k]
    pab = jnp.dot(v, ab_ref[...], preferred_element_type=jnp.float32)  # [B, 2*o*oo]
    pa = pab[:, :w]
    pb = pab[:, w:]
    prod = pa * pb
    # k-group reduction on the VPU (replaces the former r_sum matmul).
    m = prod[:, 0:oo]
    for k in range(1, o):
        m = m + prod[:, k * oo:(k + 1) * oo]
    # Jitter on the diagonal lanes: flat index i*o+j is a multiple of (o+1) iff i==j.
    lane = jax.lax.broadcasted_iota(jnp.int32, m.shape, dimension=1)
    m = m + jnp.where(lane % (o + 1) == 0, jitter, 0.0)
    o_ref[...] = m.astype(o_ref.dtype)


def psd_kernel_scatter(x_ref, w1t_ref, b1_ref, w2t_ref, b2_ref, s_ref, o_ref,
                       *, out_dim, jitter):
    """Large out_dim path: L_flat = v @ S, then batched L @ L^T via dot_general."""
    o = out_dim
    oo = o * o
    h = jnp.dot(x_ref[...], w1t_ref[...], preferred_element_type=jnp.float32)
    h = jnp.tanh(h + b1_ref[...])
    v = jnp.dot(h, w2t_ref[...], preferred_element_type=jnp.float32) + b2_ref[...]
    lf = jnp.dot(v, s_ref[...], preferred_element_type=jnp.float32)   # [B, oo]
    bb = lf.shape[0]
    L = lf.reshape(bb, o, o)
    M = jax.lax.dot_general(L, L, (((2,), (2,)), ((0,), (0,))),
                            preferred_element_type=jnp.float32)
    m = M.reshape(bb, oo)
    lane = jax.lax.broadcasted_iota(jnp.int32, m.shape, dimension=1)
    m = m + jnp.where(lane % (o + 1) == 0, jitter, 0.0)
    o_ref[...] = m.astype(o_ref.dtype)


# --------------------------------------------------------------------------- #
# Parameter packing (one-time; hoisted out of the per-call path)
# --------------------------------------------------------------------------- #
def orthogonal_init(key, shape):
    """Mirrors torch.nn.init.orthogonal_ (deterministic sign convention)."""
    rows, cols = shape
    flat = jax.random.normal(key, (max(rows, cols), min(rows, cols)), dtype=jnp.float32)
    q, r = jnp.linalg.qr(flat)
    d = jnp.sign(jnp.diag(r))
    d = jnp.where(d == 0, 1.0, d)
    q = q * d[None, :]
    if rows < cols:
        q = q.T
    return q[:rows, :cols]


def pack_psd_params(w1, b1, w2, b2, in_dim, out_dim, jitter=JITTER):
    """Right-multiply weight layout + constant scatter matrices for the PSD step."""
    # torch PSDNetwork adds an in_dim-sized jitter diagonal; this construction
    # only matches the module when out_dim == in_dim (the module default).
    assert out_dim == in_dim, "PSDNetwork jitter diag is in_dim-sized; need out_dim == in_dim"
    tri_dim = out_dim * (out_dim + 1) // 2
    rows, cols = np.tril_indices(out_dim)   # row-major lower triangle == torch.tril_indices
    p_of = {(int(i), int(k)): p for p, (i, k) in enumerate(zip(rows, cols))}
    o, oo = out_dim, out_dim * out_dim

    params = dict(
        w1_t=jnp.asarray(w1, jnp.float32).T,            # [in_dim, hidden]
        b1=jnp.asarray(b1, jnp.float32).reshape(1, -1),
        w2_t=jnp.asarray(w2, jnp.float32).T,            # [hidden, tri_dim]
        b2=jnp.asarray(b2, jnp.float32).reshape(1, -1),
        in_dim=in_dim, out_dim=out_dim, jitter=float(jitter),
    )

    if out_dim < _BILINEAR_MAX_OUT_DIM:
        # AB = [A | B]:  (v @ A)[b, k*oo+i*o+j] = L[b,i,k],  (v @ B)[...] = L[b,j,k]
        a = np.zeros((tri_dim, o * oo), np.float32)
        b = np.zeros((tri_dim, o * oo), np.float32)
        for k in range(o):
            for i in range(k, o):
                p = p_of[(i, k)]
                a[p, k * oo + i * o: k * oo + i * o + o] = 1.0        # all j
            for j in range(k, o):
                p = p_of[(j, k)]
                b[p, k * oo + j: k * oo + j + oo: o] = 1.0            # all i
        params["ab"] = jnp.asarray(np.concatenate([a, b], axis=1))    # [tri, 2*o*oo]
    else:
        # Plain scatter: (v @ S)[b, i*o + k] = L[b, i, k]
        s = np.zeros((tri_dim, oo), np.float32)
        for p, (i, k) in enumerate(zip(rows, cols)):
            s[p, i * o + k] = 1.0
        params["scatter"] = jnp.asarray(s)
    return params


def init_psd_params(key, in_dim, hidden_dim, out_dim=None, jitter=JITTER):
    if out_dim is None:
        out_dim = in_dim
    tri_dim = out_dim * (out_dim + 1) // 2
    k1, k2, k3, k4 = jax.random.split(key, 4)
    w1 = orthogonal_init(k1, (hidden_dim, in_dim))                 # lin1.weight
    b1 = jax.random.uniform(k2, (hidden_dim,), jnp.float32,
                            minval=-1.0 / np.sqrt(in_dim),
                            maxval=1.0 / np.sqrt(in_dim))          # lin1.bias
    w2 = orthogonal_init(k3, (tri_dim, hidden_dim))                # lin2.weight
    b2 = jax.random.uniform(k4, (tri_dim,), jnp.float32,
                            minval=-1.0 / np.sqrt(hidden_dim),
                            maxval=1.0 / np.sqrt(hidden_dim))      # lin2.bias
    return pack_psd_params(w1, b1, w2, b2, in_dim, out_dim, jitter)


# --------------------------------------------------------------------------- #
# Wrapper
# --------------------------------------------------------------------------- #
def _choose_block_b(batch, in_dim, hidden, tri_dim, const_w, oo,
                    budget_bytes=12 * 1024 * 1024):
    """Footprint-based batch-tile choice (f32):
       2x x-tile + 2x out-tile (double buffered) + double-buffered constants
       + live intermediates (h, v, pab/prod, m), capped at a conservative budget
       that fits every generation's default scoped VMEM."""
    const_bytes = 8 * (in_dim * hidden + hidden + hidden * tri_dim + tri_dim
                       + tri_dim * const_w)
    per_row = 4 * (2 * in_dim + 2 * oo + hidden + tri_dim + 2 * const_w + 2 * oo)
    avail = max(budget_bytes - const_bytes, per_row)
    bb = int(min(avail // per_row, 1024))
    bb = max((bb // 8) * 8, 8)
    # >= 2 grid steps for decent-size batches so the "parallel" batch axis can
    # shard across v7x's two TensorCores.
    if batch >= 16:
        half = -(-batch // 2)
        half = -(-half // 8) * 8
        bb = min(bb, half)
    # Never tile beyond the (8-padded) batch.
    b8 = -(-batch // 8) * 8
    bb = min(bb, b8)
    return max(bb, 8)


def psd_forward(t, x, params):
    """x: [B, in_dim] -> M: [B, out_dim, out_dim] (PSD)."""
    del t  # unused, matches torch forward signature
    batch, in_dim = x.shape
    out_dim = params["out_dim"]
    oo = out_dim * out_dim
    hidden = params["w1_t"].shape[1]
    tri_dim = params["w2_t"].shape[1]
    jitter = params["jitter"]

    bilinear = "ab" in params
    big_const = params["ab"] if bilinear else params["scatter"]
    const_w = big_const.shape[1]

    block_b = _choose_block_b(batch, in_dim, hidden, tri_dim, const_w, oo)
    bpad = ((batch + block_b - 1) // block_b) * block_b
    if bpad != batch:
        # Ragged batch: pad to a tile multiple (keeps the pipelined tile) and
        # slice the result, instead of a single whole-array block.
        x = jnp.pad(x, ((0, bpad - batch), (0, 0)))
    grid = (bpad // block_b,)

    if bilinear:
        kernel = functools.partial(psd_kernel_bilinear, out_dim=out_dim, jitter=jitter)
    else:
        kernel = functools.partial(psd_kernel_scatter, out_dim=out_dim, jitter=jitter)

    def const_spec(shape):
        # Constant index_map -> block stays resident in VMEM across grid steps.
        # (Constants are small after dropping r_sum/a_big redundancy, so default
        #  double-buffering of these blocks costs negligible VMEM.)
        return pl.BlockSpec(shape, lambda i: (0, 0))

    m_flat = pl.pallas_call(
        kernel,
        out_shape=jax.ShapeDtypeStruct((bpad, oo), jnp.float32),
        grid_spec=pltpu.PrefetchScalarGridSpec(
            num_scalar_prefetch=0,
            grid=grid,
            in_specs=[
                pl.BlockSpec((block_b, in_dim), lambda i: (i, 0)),
                const_spec((in_dim, hidden)),
                const_spec((1, hidden)),
                const_spec((hidden, tri_dim)),
                const_spec((1, tri_dim)),
                const_spec((tri_dim, const_w)),
            ],
            out_specs=pl.BlockSpec((block_b, oo), lambda i: (i, 0)),
        ),
        compiler_params=pltpu.CompilerParams(
            dimension_semantics=("parallel",),
            vmem_limit_bytes=32 * 1024 * 1024,
        ),
    )(x, params["w1_t"], params["b1"], params["w2_t"], params["b2"], big_const)

    return m_flat[:batch].reshape(batch, out_dim, out_dim)


# --------------------------------------------------------------------------- #
# Test
# --------------------------------------------------------------------------- #
def _reference(x, params):
    batch = x.shape[0]
    out_dim = params["out_dim"]
    w1 = params["w1_t"].T
    b1 = params["b1"][0]
    w2 = params["w2_t"].T
    b2 = params["b2"][0]
    v = jnp.tanh(x @ w1.T + b1) @ w2.T + b2
    rows, cols = np.tril_indices(out_dim)
    L = jnp.zeros((batch, out_dim, out_dim), jnp.float32).at[:, rows, cols].set(v)
    return jnp.einsum("bik,bjk->bij", L, L) + JITTER * jnp.eye(out_dim, dtype=jnp.float32)


if __name__ == "__main__":
    in_dim, hidden_dim, batch = 4, 32, 8
    out_dim = in_dim
    key = jax.random.PRNGKey(0)
    k_params, k_x, k_x2 = jax.random.split(key, 3)

    params = init_psd_params(k_params, in_dim, hidden_dim, out_dim)
    t = 0.0

    # Case 1: small batch, single grid step.
    x = jax.random.normal(k_x, (batch, in_dim), dtype=jnp.float32)
    out = jax.block_until_ready(psd_forward(t, x, params))
    assert out.shape == (batch, out_dim, out_dim)
    ref = _reference(x, params)
    err = float(jnp.max(jnp.abs(out - ref)))
    assert jnp.allclose(out, ref, atol=1e-4, rtol=1e-4), err

    # Case 2: ragged batch -> padded, multi-step "parallel" grid.
    batch2 = 20
    x2 = jax.random.normal(k_x2, (batch2, in_dim), dtype=jnp.float32)
    out2 = jax.block_until_ready(psd_forward(t, x2, params))
    assert out2.shape == (batch2, out_dim, out_dim)
    ref2 = _reference(x2, params)
    err2 = float(jnp.max(jnp.abs(out2 - ref2)))
    assert jnp.allclose(out2, ref2, atol=1e-4, rtol=1e-4), err2

    print("KERNEL_OK")
</pallas_src>

<mosaic_0001>
module attributes {stable_mosaic.version = 11 : i64} {
  func.func @psd_kernel_bilinear(%arg0: i32, %arg1: memref<8x4xf32, #tpu.memory_space<vmem>>, %arg2: memref<4x32xf32, #tpu.memory_space<vmem>>, %arg3: memref<1x32xf32, #tpu.memory_space<vmem>>, %arg4: memref<32x10xf32, #tpu.memory_space<vmem>>, %arg5: memref<1x10xf32, #tpu.memory_space<vmem>>, %arg6: memref<10x128xf32, #tpu.memory_space<vmem>>, %arg7: memref<8x16xf32, #tpu.memory_space<vmem>>) attributes {dimension_semantics = [#tpu.dimension_semantics<parallel>], iteration_bounds = array<i64: 1>, scalar_prefetch = 0 : i64, scratch_operands = 0 : i64, tpu.core_type = #tpu.core_type<tc>, window_params = [{transform_indices = @transform_0, window_bounds = array<i64: 8, 4>}, {pipeline_mode = #tpu.pipeline_mode<synchronous>, transform_indices = @transform_1, window_bounds = array<i64: 4, 32>}, {pipeline_mode = #tpu.pipeline_mode<synchronous>, transform_indices = @transform_2, window_bounds = array<i64: 1, 32>}, {pipeline_mode = #tpu.pipeline_mode<synchronous>, transform_indices = @transform_3, window_bounds = array<i64: 32, 10>}, {pipeline_mode = #tpu.pipeline_mode<synchronous>, transform_indices = @transform_4, window_bounds = array<i64: 1, 10>}, {pipeline_mode = #tpu.pipeline_mode<synchronous>, transform_indices = @transform_5, window_bounds = array<i64: 10, 128>}, {transform_indices = @transform_6, window_bounds = array<i64: 8, 16>}]} {
    %c0 = arith.constant 0 : index
    %c0_0 = arith.constant 0 : index
    %0 = vector.load %arg1[%c0, %c0_0] : memref<8x4xf32, #tpu.memory_space<vmem>>, vector<8x4xf32>
    %c0_1 = arith.constant 0 : index
    %c0_2 = arith.constant 0 : index
    %1 = vector.load %arg2[%c0_1, %c0_2] : memref<4x32xf32, #tpu.memory_space<vmem>>, vector<4x32xf32>
    %cst = arith.constant dense<0.000000e+00> : vector<8x32xf32>
    %2 = tpu.matmul %0, %1, %cst {dimension_numbers = #tpu.dot_dimension_numbers<[1], [0], [0], [1], [0, 0, 1, 1], [], []>} : vector<8x4xf32>, vector<4x32xf32>, vector<8x32xf32> -> vector<8x32xf32>
    %c0_3 = arith.constant 0 : index
    %c0_4 = arith.constant 0 : index
    %3 = vector.load %arg3[%c0_3, %c0_4] : memref<1x32xf32, #tpu.memory_space<vmem>>, vector<1x32xf32>
    %4 = vector.broadcast %3 : vector<1x32xf32> to vector<8x32xf32>
    %5 = arith.addf %2, %4 : vector<8x32xf32>
    %6 = math.tanh %5 : vector<8x32xf32>
    %c0_5 = arith.constant 0 : index
    %c0_6 = arith.constant 0 : index
    %7 = vector.load %arg4[%c0_5, %c0_6] : memref<32x10xf32, #tpu.memory_space<vmem>>, vector<32x10xf32>
    %cst_7 = arith.constant dense<0.000000e+00> : vector<8x10xf32>
    %8 = tpu.matmul %6, %7, %cst_7 {dimension_numbers = #tpu.dot_dimension_numbers<[1], [0], [0], [1], [0, 0, 1, 1], [], []>} : vector<8x32xf32>, vector<32x10xf32>, vector<8x10xf32> -> vector<8x10xf32>
    %c0_8 = arith.constant 0 : index
    %c0_9 = arith.constant 0 : index
    %9 = vector.load %arg5[%c0_8, %c0_9] : memref<1x10xf32, #tpu.memory_space<vmem>>, vector<1x10xf32>
    %10 = vector.broadcast %9 : vector<1x10xf32> to vector<8x10xf32>
    %11 = arith.addf %8, %10 : vector<8x10xf32>
    %c0_10 = arith.constant 0 : index
    %c0_11 = arith.constant 0 : index
    %12 = vector.load %arg6[%c0_10, %c0_11] : memref<10x128xf32, #tpu.memory_space<vmem>>, vector<10x128xf32>
    %cst_12 = arith.constant dense<0.000000e+00> : vector<8x128xf32>
    %13 = tpu.matmul %11, %12, %cst_12 {dimension_numbers = #tpu.dot_dimension_numbers<[1], [0], [0], [1], [0, 0, 1, 1], [], []>} : vector<8x10xf32>, vector<10x128xf32>, vector<8x128xf32> -> vector<8x128xf32>
    %14 = vector.extract_strided_slice %13 {offsets = [0, 0], sizes = [8, 64], strides = [1, 1]} : vector<8x128xf32> to vector<8x64xf32>
    %15 = vector.extract_strided_slice %13 {offsets = [0, 64], sizes = [8, 64], strides = [1, 1]} : vector<8x128xf32> to vector<8x64xf32>
    %16 = arith.mulf %14, %15 : vector<8x64xf32>
    %17 = vector.extract_strided_slice %16 {offsets = [0, 0], sizes = [8, 16], strides = [1, 1]} : vector<8x64xf32> to vector<8x16xf32>
    %18 = vector.extract_strided_slice %16 {offsets = [0, 16], sizes = [8, 16], strides = [1, 1]} : vector<8x64xf32> to vector<8x16xf32>
    %19 = arith.addf %17, %18 : vector<8x16xf32>
    %20 = vector.extract_strided_slice %16 {offsets = [0, 32], sizes = [8, 16], strides = [1, 1]} : vector<8x64xf32> to vector<8x16xf32>
    %21 = arith.addf %19, %20 : vector<8x16xf32>
    %22 = vector.extract_strided_slice %16 {offsets = [0, 48], sizes = [8, 16], strides = [1, 1]} : vector<8x64xf32> to vector<8x16xf32>
    %23 = arith.addf %21, %22 : vector<8x16xf32>
    %24 = tpu.iota {dimensions = array<i32: 1>} : vector<8x16xi32>
    %c5_i32 = arith.constant 5 : i32
    %c0_i32 = arith.constant 0 : i32
    %25 = arith.cmpi eq, %c5_i32, %c0_i32 : i32
    %c1_i32 = arith.constant 1 : i32
    %26 = arith.select %25, %c1_i32, %c5_i32 : i32
    %27 = vector.broadcast %26 : i32 to vector<8x16xi32>
    %28 = arith.remsi %24, %27 : vector<8x16xi32>
    %c0_i32_13 = arith.constant 0 : i32
    %29 = vector.broadcast %c0_i32_13 : i32 to vector<8x16xi32>
    %30 = arith.cmpi ne, %28, %29 : vector<8x16xi32>
    %c0_i32_14 = arith.constant 0 : i32
    %31 = vector.broadcast %c0_i32_14 : i32 to vector<8x16xi32>
    %32 = arith.cmpi slt, %28, %31 : vector<8x16xi32>
    %c0_i32_15 = arith.constant 0 : i32
    %33 = arith.cmpi slt, %26, %c0_i32_15 : i32
    %34 = vector.broadcast %33 : i1 to vector<8x16xi1>
    %35 = vector.broadcast %34 : vector<8x16xi1> to vector<8x16xi1>
    %36 = arith.xori %32, %35 : vector<8x16xi1>
    %37 = arith.andi %36, %30 : vector<8x16xi1>
    %38 = vector.broadcast %26 : i32 to vector<8x16xi32>
    %39 = arith.addi %28, %38 : vector<8x16xi32>
    %40 = arith.select %37, %39, %28 : vector<8x16xi1>, vector<8x16xi32>
    %c0_i32_16 = arith.constant 0 : i32
    %41 = vector.broadcast %c0_i32_16 : i32 to vector<8x16xi32>
    %42 = arith.cmpi eq, %40, %41 : vector<8x16xi32>
    %cst_17 = arith.constant 9.99999974E-6 : f32
    %cst_18 = arith.constant 0.000000e+00 : f32
    %43 = vector.broadcast %cst_17 : f32 to vector<8x16xf32>
    %44 = vector.broadcast %cst_18 : f32 to vector<8x16xf32>
    %45 = arith.select %42, %43, %44 : vector<8x16xi1>, vector<8x16xf32>
    %46 = arith.addf %23, %45 : vector<8x16xf32>
    %c0_19 = arith.constant 0 : index
    %c0_20 = arith.constant 0 : index
    %47 = vector.load %arg7[%c0_19, %c0_20] : memref<8x16xf32, #tpu.memory_space<vmem>>, vector<8x16xf32>
    tpu.vector_store %arg7[%c0_19, %c0_20], %46 {strides = array<i32>} : memref<8x16xf32, #tpu.memory_space<vmem>>, vector<8x16xf32>,
    return
  }
  func.func @transform_0(%arg0: i32) -> (i32, i32) {
    %c0_i32 = arith.constant 0 : i32
    %c0_i32_0 = arith.constant 0 : i32
    return %arg0, %c0_i32 : i32, i32
  }
  func.func @transform_1(%arg0: i32) -> (i32, i32) {
    %c0_i32 = arith.constant 0 : i32
    %c0_i32_0 = arith.constant 0 : i32
    %c0_i32_1 = arith.constant 0 : i32
    return %c0_i32, %c0_i32_0 : i32, i32
  }
  func.func @transform_2(%arg0: i32) -> (i32, i32) {
    %c0_i32 = arith.constant 0 : i32
    %c0_i32_0 = arith.constant 0 : i32
    %c0_i32_1 = arith.constant 0 : i32
    return %c0_i32, %c0_i32_0 : i32, i32
  }
  func.func @transform_3(%arg0: i32) -> (i32, i32) {
    %c0_i32 = arith.constant 0 : i32
    %c0_i32_0 = arith.constant 0 : i32
    %c0_i32_1 = arith.constant 0 : i32
    return %c0_i32, %c0_i32_0 : i32, i32
  }
  func.func @transform_4(%arg0: i32) -> (i32, i32) {
    %c0_i32 = arith.constant 0 : i32
    %c0_i32_0 = arith.constant 0 : i32
    %c0_i32_1 = arith.constant 0 : i32
    return %c0_i32, %c0_i32_0 : i32, i32
  }
  func.func @transform_5(%arg0: i32) -> (i32, i32) {
    %c0_i32 = arith.constant 0 : i32
    %c0_i32_0 = arith.constant 0 : i32
    %c0_i32_1 = arith.constant 0 : i32
    return %c0_i32, %c0_i32_0 : i32, i32
  }
  func.func @transform_6(%arg0: i32) -> (i32, i32) {
    %c0_i32 = arith.constant 0 : i32
    %c0_i32_0 = arith.constant 0 : i32
    return %arg0, %c0_i32 : i32, i32
  }
}

</mosaic_0001>

<bundles_post_ra>
// kernel: tpu_custom_call.1
= control target key start
LH: loop header
LB: loop body
LE: loop exit
PB: predicated region body
PF: predicated region fallthrough
CT: control target
= control target key end

     0   :  { %vm37_vm0 = vcmask 1043456   ;;  %v419_v2 = vmov 0.0   ;;  %vm420_vm1 = vmmov 0   ;;  %vm33_vm2 = vcmask 31744   ;;  %s514_s0 = inlined_call_operand.vmem [shape: f32[8,4], index: 0, kind: input, shape index: {}]   ;;  %s515_s1 = inlined_call_operand.vmem [shape: f32[4,32], index: 1, kind: input, shape index: {}]   ;;  %s516_s2 = inlined_call_operand.vmem [shape: f32[1,32], index: 2, kind: input, shape index: {}]   ;;  %s517_s3 = inlined_call_operand.vmem [shape: f32[32,10], index: 3, kind: input, shape index: {}]   ;;  %s518_s4 = inlined_call_operand.vmem [shape: f32[1,10], index: 4, kind: input, shape index: {}]   ;;  %s519_s5 = inlined_call_operand.vmem [shape: f32[10,128], index: 5, kind: input, shape index: {}]   ;;  %s520_s6 = inlined_call_operand.hbm [shape: f32[8,16], index: 6, kind: output, shape index: {}]  }
   0x1   :  { %v25_v0 = vld [vmem:[%s515_s1] sm:$0xf]  ;;  %349 = vmatprep.subr.mxu0 %v419_v2  ;;  %351 = vmatprep.mubr.msk.f32.mxu0 %vm420_vm1, %v419_v2 }
   0x2   :  { %v24_v1 = vld [vmem:[%s514_s0] sm:$0xff] }
   0x3   :  { %11 = vsyncpa [#allocation3], 0  ;;  %350 = vmatpush3.msk.msra.mxu0 %vm37_vm0, %v25_v0  ;;  %362 = vmatprep.mubr.msk.f32.mxu1 %vm420_vm1, %v419_v2  ;;  %v112_v3 = vld [vmem:[%s517_s3] sm:$0xff]  ;;  %v113_v4 = vld [vmem:[%s517_s3 + $0x8] sm:$0xff]  ;;  %v421_v6 = vmov 0.0|0.0   ;;  %vm203_vm3 = vcmask 1041408   ;;  %v295_v26 = vlaneseq }
   0x4   :  { %352 = vmatmul.mubr.msk.f32.vlgmr.msra.gmra.mrb[0].mxu0 %vm33_vm2, %v24_v1  ;;  %v114_v5 = vld [vmem:[%s517_s3 + $0x10] sm:$0xff]  ;;  %372 = vmatprep.subr.bf16.mxu1 %v421_v6  ;;  %v373_v7 = vpack.c.bf16 %v113_v4, %v112_v3  ;;  %v115_v8 = vld [vmem:[%s517_s3 + $0x18] sm:$0xff]  ;;  %v197_v10 = vld [vmem:[%s519_s5] sm:$0xff]  ;;  %vm422_vm4 = vmmov 1   ;;  %vm123_vm6 = vcmask 261120   ;;  %vm199_vm7 = vcmask 80896  }
   0x5   :  { %369 = vmatprep.mubr.msk.f32.mxu0 %vm420_vm1, %v419_v2  ;;  %378 = vmatprep.subr.bf16.mxu0 %v421_v6  ;;  %v376_v9 = vpack.c.bf16 %v115_v8, %v114_v5  ;;  %v198_v11 = vld [vmem:[%s519_s5 + $0x8] sm:$0x3]  ;;  %vm380_vm5 = vmpackc.low %vm203_vm3, %vm422_vm4  ;;  %v332_v13 = vld [vmem:[%s516_s2] ss:$0 sm:$0xff]  ;;  %s423_s5 = smov 64   ;;  %s424_s2 = smov 96  }
   0x6   :  { %374 = vmatpush3.bf16.msra.mxu1 %v373_v7  ;;  %v379_v12 = vpack.c.bf16 %v198_v11, %v197_v10  ;;  %v335_v18 = vld [vmem:[%s518_s4] ss:$0 sm:$0xff]  ;;  %s425_s14 = smov 112   ;;  %s426_s15 = smov 80   ;;  %v296_v27 = vand.u32 127, %v295_v26  ;;  %vm316_vm12 = vcmask 130048  }
   0x7   :  { %375 = vmatprep.subr.bf16.mxu1 %v421_v6  ;;  %s427_s4 = smov [#allocation2]  }
   0x8   :  { %381 = vmatpush3.bf16.msk.msra.mxu0 %vm380_vm5, %v379_v12  ;;  %v497_v28 = vmul.u32.u64.low 3435973837, %v296_v27  ;;  %v498_v29 = vmul.u32.u64.high 3435973837, %v296_v27, %v497_v28  ;;  %s324_s16 = sshll.u32 %s427_s4, 4  ;;  %s325_s16 = int_to_ptr.vmem [resolvable:$true] %s324_s16 }
   0x9   :  { %s395_s17 = scalar_lea.vmem %s325_s16, 128  ;;  %p400_p1 = scmp.lt.s32.totalorder %s325_s16, %s325_s16 }
   0xa   :  { %377 = vmatpush3.bf16.msra.mxu1 %v376_v9  ;;  %v303_v30 = vshrl.u32 %v498_v29, 2  ;;  %p396_p0 = scmp.ne.s32.totalorder %s325_s16, %s395_s17  ;;  %p401_p2 = scmp.lt.s32.totalorder %s395_s17, %s395_s17 }
   0xc   :  { %v304_v31 = vmul.u32 5, %v303_v30  ;;  %p402_p3 = por %p401_p2, %p400_p1 }
   0xe   :  { %v305_v32 = vsub.s32 %v296_v27, %v304_v31  ;;  %p403_p4 = pnand %p402_p3, %p396_p0 }
  0x10   :  { %vm308_vm8 = vcmp.ne.s32.totalorder %v305_v32, 0  ;;  %vm309_vm9 = vcmp.lt.s32.totalorder %v305_v32, 0  ;;  %v311_v33 = vadd.s32 5, %v305_v32 }
  0x11   :  { %vm310_vm10 = vmand %vm309_vm9, %vm308_vm8 }
  0x12   :  { %v312_v34 = vsel %vm310_vm10, %v311_v33, %v305_v32 }
  0x13   :  { %vm313_vm11 = vcmp.eq.s32.totalorder %v312_v34, 0 }
  0x14   :  { %v314_v39 = vsel %vm313_vm11, 1e-05, %v419_v2 }
  0xd7   :  { %v107_v14 = vpop.f32.mrb[0].mxu0 }
  0xd8   :  { %v108_v15 = vadd.f32 %v332_v13, %v107_v14  ;;  %v353_v16 = vpop.f32.mrb[1].mxu0 }
  0xda   :  { %393 = vtanh.f32 %v108_v15 }
  0xe4   :  { %v394_v17 = vpop.eup %393 }
  0xe5   :  { %363 = vmatmul.mubr.msk.f32.vlgmr.msra.gmra.mrb[0].mxu1 %vm123_vm6, %v394_v17 }
 0x1b8   :  { %v193_v19 = vpop.f32.mrb[0].mxu1 }
 0x1b9   :  { %v194_v20 = vadd.f32 %v335_v18, %v193_v19  ;;  %v364_v21 = vpop.f32.mrb[1].mxu1 }
 0x1bb   :  { %370 = vmatmul.mubr.msk.f32.vlgmr.msra.gmra.mrb[2].mxu0 %vm199_vm7, %v194_v20 }
 0x28e   :  { %v273_v22 = vpop.f32.mrb[2].mxu0 }
 0x28f   :  { %278 = vrot.lane.b32.xlu0 %v273_v22, %s423_s5  ;;  %v371_v23 = vpop.f32.mrb[3].mxu0 }
 0x301   :  { %v279_v24 = vpop.permute.xlu0 %278 }
 0x302   :  { %v281_v25 = vmul.f32 %v279_v24, %v273_v22 }
 0x304   :  { %287 = vrot.lane.b32.xlu1 %v281_v25, %s424_s2  ;;  %283 = vrot.lane.b32.xlu0 %v281_v25, %s425_s14 }
 0x308   :  { %291 = vrot.lane.b32.xlu1 %v281_v25, %s426_s15 }
 0x376   :  { %v288_v35 = vpop.permute.xlu1 %287  ;;  %v284_v36 = vpop.permute.xlu0 %283 }
 0x377   :  { %v286_v37 = vadd.f32 %v284_v36, %v281_v25 }
 0x379   :  { %v290_v38 = vadd.f32 %v288_v35, %v286_v37 }
 0x37a   :  { %v292_v40 = vpop.permute.xlu1 %291 }
 0x37b   :  { %v294_v41 = vadd.f32 %v292_v40, %v290_v38 }
 0x37d   :  { %v315_v42 = vadd.f32 %v314_v39, %v294_v41 }
 0x37f   :  { %317 = vst.msk [vmem:[#allocation2] sm:$0xff] %vm316_vm12, %v315_v42 }
 0x380   :  { %406 = shalt.err (!%p403_p4)
}
 0x381   :  { %s407_s20 = scalar_lea.hbm %s520_s6, 128 }
 0x382   :  { %p408_p5 = scmp.ne.s32.totalorder %s520_s6, %s407_s20  ;;  %p411_p6 = scmp.lt.u32.totalorder %s407_s20, %s520_s6 }
 0x384   :  { %p413_p7 = pnand %p411_p6, %p408_p5 }
 0x386   :  { %416 = shalt.err (!%p413_p7)
}
 0x387   :  { %327 = dma.vmem_to_hbm [thread:$0]  %s325_s16, 128, %s520_s6, [#allocation3]  }
 0x388   :  { %417 = dma.done.wait [#allocation3], 128  }
 0x389   :  { %418 = vsyncadd [#allocation3], 4294967168 }
 0x38a   :  { %331 = vsyncpa [#allocation3], 1 }

</bundles_post_ra>
